<compile_context>
chip_gen: v5e
topology: v5e:2x2
jax: 0.10.0
libtpu: 0.0.40
codegen_flags: <defaults>
</compile_context>

<pallas_src>
import jax
import jax.numpy as jnp
from jax.experimental import pallas as pl
from jax.experimental.pallas import tpu as pltpu


def _build_flip_metadata(keypoints, skeleton, hflip):
    """Python re-implementation of PafHFlip.__init__ index computation."""
    skeleton_names = [(keypoints[j1 - 1], keypoints[j2 - 1]) for j1, j2 in skeleton]
    flipped_skeleton_names = [
        (hflip[j1] if j1 in hflip else j1, hflip[j2] if j2 in hflip else j2)
        for j1, j2 in skeleton_names
    ]
    flip_indices = list(range(len(skeleton)))
    reverse_direction = []
    for paf_i, (n1, n2) in enumerate(skeleton_names):
        if (n1, n2) in flipped_skeleton_names:
            flip_indices[paf_i] = flipped_skeleton_names.index((n1, n2))
        if (n2, n1) in flipped_skeleton_names:
            flip_indices[paf_i] = flipped_skeleton_names.index((n2, n1))
            reverse_direction.append(paf_i)
    return flip_indices, reverse_direction


def _paf_hflip_kernel(flip_ref, swap_ref, x_ref, r1_ref, r2_ref,
                      o0_ref, o1_ref, o2_ref):
    # flip_ref was already consumed by the input index_maps (channel gather).
    del flip_ref
    B, H, W = x_ref.shape

    # W-reversal as a 0/1 permutation matrix, built in-register (no HBM
    # operand, no extra double-buffered VMEM tile).  Exact in fp32.
    ri = jax.lax.broadcasted_iota(jnp.int32, (W, W), 0)
    ci = jax.lax.broadcasted_iota(jnp.int32, (W, W), 1)
    rev = (ri + ci == (W - 1)).astype(jnp.float32)

    x = x_ref[...].astype(jnp.float32)     # (B, H, W)
    r1 = r1_ref[...].astype(jnp.float32)   # (B, 2, H, W)
    r2 = r2_ref[...].astype(jnp.float32)   # (B, 2, H, W)

    # Stack all 5*B (H, W) planes -> one (5*B*H, W) @ (W, W) MXU product.
    planes = []
    for b in range(B):
        planes += [x[b], r1[b, 0], r1[b, 1], r2[b, 0], r2[b, 1]]
    stacked = jnp.concatenate(planes, axis=0)                       # (5*B*H, W)
    flipped = jnp.dot(stacked, rev, preferred_element_type=jnp.float32)

    xi, a0, a1, b0, b1 = [], [], [], [], []
    for b in range(B):
        off = 5 * b * H
        xi.append(flipped[off:off + H])                 # intensities
        a0.append(-flipped[off + H:off + 2 * H])        # regs1 x (negated)
        a1.append(flipped[off + 2 * H:off + 3 * H])     # regs1 y
        b0.append(-flipped[off + 3 * H:off + 4 * H])    # regs2 x (negated)
        b1.append(flipped[off + 4 * H:off + 5 * H])     # regs2 y
        o0_ref[b] = xi[b].astype(o0_ref.dtype)

    # reverse_direction: swap regs1 <-> regs2 for this output channel.
    swap = swap_ref[pl.program_id(0)] != 0
    dt1, dt2 = o1_ref.dtype, o2_ref.dtype

    @pl.when(swap)
    def _():
        for b in range(B):
            o1_ref[b, 0] = b0[b].astype(dt1)
            o1_ref[b, 1] = b1[b].astype(dt1)
            o2_ref[b, 0] = a0[b].astype(dt2)
            o2_ref[b, 1] = a1[b].astype(dt2)

    @pl.when(jnp.logical_not(swap))
    def _():
        for b in range(B):
            o1_ref[b, 0] = a0[b].astype(dt1)
            o1_ref[b, 1] = a1[b].astype(dt1)
            o2_ref[b, 0] = b0[b].astype(dt2)
            o2_ref[b, 1] = b1[b].astype(dt2)


def paf_hflip(intensity, reg1, reg2, flip_idx, swap_flags):
    B, C, H, W = intensity.shape
    assert reg1.shape == (B, C, 2, H, W) and reg2.shape == (B, C, 2, H, W)

    out0, out1, out2 = pl.pallas_call(
        _paf_hflip_kernel,
        out_shape=(jax.ShapeDtypeStruct((B, C, H, W), intensity.dtype),
                   jax.ShapeDtypeStruct((B, C, 2, H, W), reg1.dtype),
                   jax.ShapeDtypeStruct((B, C, 2, H, W), reg2.dtype)),
        grid_spec=pltpu.PrefetchScalarGridSpec(
            num_scalar_prefetch=2,
            grid=(C,),
            in_specs=[
                pl.BlockSpec((B, None, H, W),
                             lambda c, flip, swap: (0, flip[c], 0, 0)),
                pl.BlockSpec((B, None, 2, H, W),
                             lambda c, flip, swap: (0, flip[c], 0, 0, 0)),
                pl.BlockSpec((B, None, 2, H, W),
                             lambda c, flip, swap: (0, flip[c], 0, 0, 0)),
            ],
            out_specs=[
                pl.BlockSpec((B, None, H, W),
                             lambda c, flip, swap: (0, c, 0, 0)),
                pl.BlockSpec((B, None, 2, H, W),
                             lambda c, flip, swap: (0, c, 0, 0, 0)),
                pl.BlockSpec((B, None, 2, H, W),
                             lambda c, flip, swap: (0, c, 0, 0, 0)),
            ],
        ),
        compiler_params=pltpu.CompilerParams(
            dimension_semantics=("parallel",)),
    )(flip_idx, swap_flags, intensity, reg1, reg2)

    return [out0, out1, out2]


def ref_forward(fields, flip_idx, reverse_direction):
    """Pure-JAX reference mirroring the PyTorch forward exactly."""
    out = []
    for f in fields:
        f = jnp.take(f, flip_idx, axis=1)       # torch.index_select(dim=1)
        f = jnp.flip(f, axis=-1)                # torch.flip(dims=[-1])
        out.append(f)
    out[1] = out[1].at[:, :, 0].multiply(-1.0)
    out[2] = out[2].at[:, :, 0].multiply(-1.0)
    o1, o2 = out[1], out[2]
    for paf_i in reverse_direction:
        cc = o1[:, paf_i]
        o1 = o1.at[:, paf_i].set(o2[:, paf_i])
        o2 = o2.at[:, paf_i].set(cc)
    out[1], out[2] = o1, o2
    return out


if __name__ == "__main__":
    # Deterministic synthetic keypoint / skeleton / hflip metadata
    keypoints = ["nose", "left_eye", "right_eye", "left_shoulder",
                 "right_shoulder", "left_wrist", "right_wrist"]
    hflip = {"left_eye": "right_eye", "right_eye": "left_eye",
             "left_shoulder": "right_shoulder", "right_shoulder": "left_shoulder",
             "left_wrist": "right_wrist", "right_wrist": "left_wrist"}
    skeleton = [(1, 2), (1, 3), (2, 4), (3, 5), (4, 6), (5, 7), (4, 5), (6, 7)]

    flip_indices, reverse_direction = _build_flip_metadata(keypoints, skeleton, hflip)

    B, H, W = 2, 16, 16
    C = len(skeleton)  # 8 PAF channels

    key = jax.random.PRNGKey(0)
    k0, k1, k2 = jax.random.split(key, 3)
    intensity = jax.random.normal(k0, (B, C, H, W), dtype=jnp.float32)
    reg1 = jax.random.normal(k1, (B, C, 2, H, W), dtype=jnp.float32)
    reg2 = jax.random.normal(k2, (B, C, 2, H, W), dtype=jnp.float32)

    flip_idx = jnp.asarray(flip_indices, dtype=jnp.int32)
    swap_flags = jnp.zeros((C,), dtype=jnp.int32)
    if reverse_direction:
        swap_flags = swap_flags.at[jnp.asarray(reverse_direction, jnp.int32)].set(1)

    out = paf_hflip(intensity, reg1, reg2, flip_idx, swap_flags)
    out = jax.block_until_ready(out)

    ref = ref_forward([intensity, reg1, reg2], flip_idx, reverse_direction)
    for o, r in zip(out, ref):
        assert o.shape == r.shape and o.dtype == r.dtype
        assert jnp.allclose(o, r, atol=1e-5, rtol=1e-5), "kernel/reference mismatch"

    print("KERNEL_OK")
</pallas_src>

<mosaic_0001>
module attributes {stable_mosaic.version = 11 : i64} {
  func.func @_paf_hflip_kernel(%arg0: i32, %arg1: memref<8xi32, #tpu.memory_space<smem>>, %arg2: memref<8xi32, #tpu.memory_space<smem>>, %arg3: memref<2x1x16x16xf32, #tpu.memory_space<vmem>>, %arg4: memref<2x1x2x16x16xf32, #tpu.memory_space<vmem>>, %arg5: memref<2x1x2x16x16xf32, #tpu.memory_space<vmem>>, %arg6: memref<2x1x16x16xf32, #tpu.memory_space<vmem>>, %arg7: memref<2x1x2x16x16xf32, #tpu.memory_space<vmem>>, %arg8: memref<2x1x2x16x16xf32, #tpu.memory_space<vmem>>) attributes {dimension_semantics = [#tpu.dimension_semantics<parallel>], iteration_bounds = array<i64: 8>, scalar_prefetch = 2 : i64, scratch_operands = 0 : i64, tpu.core_type = #tpu.core_type<tc>, window_params = [{transform_indices = @transform_0, window_bounds = array<i64: 2, 1, 16, 16>}, {transform_indices = @transform_1, window_bounds = array<i64: 2, 1, 2, 16, 16>}, {transform_indices = @transform_2, window_bounds = array<i64: 2, 1, 2, 16, 16>}, {transform_indices = @transform_3, window_bounds = array<i64: 2, 1, 16, 16>}, {transform_indices = @transform_4, window_bounds = array<i64: 2, 1, 2, 16, 16>}, {transform_indices = @transform_5, window_bounds = array<i64: 2, 1, 2, 16, 16>}]} {
    %0 = tpu.iota {dimensions = array<i32: 0>} : vector<16x16xi32>
    %1 = tpu.iota {dimensions = array<i32: 1>} : vector<16x16xi32>
    %2 = arith.addi %0, %1 : vector<16x16xi32>
    %c15_i32 = arith.constant 15 : i32
    %3 = vector.broadcast %c15_i32 : i32 to vector<16x16xi32>
    %4 = arith.cmpi eq, %2, %3 : vector<16x16xi32>
    %5 = arith.extui %4 : vector<16x16xi1> to vector<16x16xi32>
    %6 = arith.sitofp %5 : vector<16x16xi32> to vector<16x16xf32>
    %c0 = arith.constant 0 : index
    %c0_0 = arith.constant 0 : index
    %c0_1 = arith.constant 0 : index
    %c0_2 = arith.constant 0 : index
    %7 = vector.load %arg3[%c0, %c0_0, %c0_1, %c0_2] : memref<2x1x16x16xf32, #tpu.memory_space<vmem>>, vector<2x1x16x16xf32>
    %8 = vector.shape_cast %7 : vector<2x1x16x16xf32> to vector<2x16x16xf32>
    %c0_3 = arith.constant 0 : index
    %c0_4 = arith.constant 0 : index
    %c0_5 = arith.constant 0 : index
    %c0_6 = arith.constant 0 : index
    %c0_7 = arith.constant 0 : index
    %9 = vector.load %arg4[%c0_3, %c0_4, %c0_5, %c0_6, %c0_7] : memref<2x1x2x16x16xf32, #tpu.memory_space<vmem>>, vector<2x1x2x16x16xf32>
    %10 = vector.shape_cast %9 : vector<2x1x2x16x16xf32> to vector<2x2x16x16xf32>
    %c0_8 = arith.constant 0 : index
    %c0_9 = arith.constant 0 : index
    %c0_10 = arith.constant 0 : index
    %c0_11 = arith.constant 0 : index
    %c0_12 = arith.constant 0 : index
    %11 = vector.load %arg5[%c0_8, %c0_9, %c0_10, %c0_11, %c0_12] : memref<2x1x2x16x16xf32, #tpu.memory_space<vmem>>, vector<2x1x2x16x16xf32>
    %12 = vector.shape_cast %11 : vector<2x1x2x16x16xf32> to vector<2x2x16x16xf32>
    %13 = vector.extract_strided_slice %8 {offsets = [0, 0, 0], sizes = [1, 16, 16], strides = [1, 1, 1]} : vector<2x16x16xf32> to vector<1x16x16xf32>
    %14 = vector.shape_cast %13 : vector<1x16x16xf32> to vector<16x16xf32>
    %15 = vector.extract_strided_slice %10 {offsets = [0, 0, 0, 0], sizes = [1, 1, 16, 16], strides = [1, 1, 1, 1]} : vector<2x2x16x16xf32> to vector<1x1x16x16xf32>
    %16 = vector.shape_cast %15 : vector<1x1x16x16xf32> to vector<16x16xf32>
    %17 = vector.extract_strided_slice %10 {offsets = [0, 1, 0, 0], sizes = [1, 1, 16, 16], strides = [1, 1, 1, 1]} : vector<2x2x16x16xf32> to vector<1x1x16x16xf32>
    %18 = vector.shape_cast %17 : vector<1x1x16x16xf32> to vector<16x16xf32>
    %19 = vector.extract_strided_slice %12 {offsets = [0, 0, 0, 0], sizes = [1, 1, 16, 16], strides = [1, 1, 1, 1]} : vector<2x2x16x16xf32> to vector<1x1x16x16xf32>
    %20 = vector.shape_cast %19 : vector<1x1x16x16xf32> to vector<16x16xf32>
    %21 = vector.extract_strided_slice %12 {offsets = [0, 1, 0, 0], sizes = [1, 1, 16, 16], strides = [1, 1, 1, 1]} : vector<2x2x16x16xf32> to vector<1x1x16x16xf32>
    %22 = vector.shape_cast %21 : vector<1x1x16x16xf32> to vector<16x16xf32>
    %23 = vector.extract_strided_slice %8 {offsets = [1, 0, 0], sizes = [1, 16, 16], strides = [1, 1, 1]} : vector<2x16x16xf32> to vector<1x16x16xf32>
    %24 = vector.shape_cast %23 : vector<1x16x16xf32> to vector<16x16xf32>
    %25 = vector.extract_strided_slice %10 {offsets = [1, 0, 0, 0], sizes = [1, 1, 16, 16], strides = [1, 1, 1, 1]} : vector<2x2x16x16xf32> to vector<1x1x16x16xf32>
    %26 = vector.shape_cast %25 : vector<1x1x16x16xf32> to vector<16x16xf32>
    %27 = vector.extract_strided_slice %10 {offsets = [1, 1, 0, 0], sizes = [1, 1, 16, 16], strides = [1, 1, 1, 1]} : vector<2x2x16x16xf32> to vector<1x1x16x16xf32>
    %28 = vector.shape_cast %27 : vector<1x1x16x16xf32> to vector<16x16xf32>
    %29 = vector.extract_strided_slice %12 {offsets = [1, 0, 0, 0], sizes = [1, 1, 16, 16], strides = [1, 1, 1, 1]} : vector<2x2x16x16xf32> to vector<1x1x16x16xf32>
    %30 = vector.shape_cast %29 : vector<1x1x16x16xf32> to vector<16x16xf32>
    %31 = vector.extract_strided_slice %12 {offsets = [1, 1, 0, 0], sizes = [1, 1, 16, 16], strides = [1, 1, 1, 1]} : vector<2x2x16x16xf32> to vector<1x1x16x16xf32>
    %32 = vector.shape_cast %31 : vector<1x1x16x16xf32> to vector<16x16xf32>
    %33 = tpu.concatenate %14, %16, %18, %20, %22, %24, %26, %28, %30, %32 in 0 : vector<16x16xf32>, vector<16x16xf32>, vector<16x16xf32>, vector<16x16xf32>, vector<16x16xf32>, vector<16x16xf32>, vector<16x16xf32>, vector<16x16xf32>, vector<16x16xf32>, vector<16x16xf32> -> vector<160x16xf32>
    %cst = arith.constant dense<0.000000e+00> : vector<160x16xf32>
    %34 = tpu.matmul %33, %6, %cst {dimension_numbers = #tpu.dot_dimension_numbers<[1], [0], [0], [1], [0, 0, 1, 1], [], []>} : vector<160x16xf32>, vector<16x16xf32>, vector<160x16xf32> -> vector<160x16xf32>
    %35 = vector.extract_strided_slice %34 {offsets = [0, 0], sizes = [16, 16], strides = [1, 1]} : vector<160x16xf32> to vector<16x16xf32>
    %36 = vector.extract_strided_slice %34 {offsets = [16, 0], sizes = [16, 16], strides = [1, 1]} : vector<160x16xf32> to vector<16x16xf32>
    %cst_13 = arith.constant 0.000000e+00 : f32
    %37 = vector.broadcast %cst_13 : f32 to vector<16x16xf32>
    %38 = arith.subf %37, %36 : vector<16x16xf32>
    %39 = vector.extract_strided_slice %34 {offsets = [32, 0], sizes = [16, 16], strides = [1, 1]} : vector<160x16xf32> to vector<16x16xf32>
    %40 = vector.extract_strided_slice %34 {offsets = [48, 0], sizes = [16, 16], strides = [1, 1]} : vector<160x16xf32> to vector<16x16xf32>
    %cst_14 = arith.constant 0.000000e+00 : f32
    %41 = vector.broadcast %cst_14 : f32 to vector<16x16xf32>
    %42 = arith.subf %41, %40 : vector<16x16xf32>
    %43 = vector.extract_strided_slice %34 {offsets = [64, 0], sizes = [16, 16], strides = [1, 1]} : vector<160x16xf32> to vector<16x16xf32>
    %c0_15 = arith.constant 0 : index
    %c0_16 = arith.constant 0 : index
    %c0_17 = arith.constant 0 : index
    %c0_18 = arith.constant 0 : index
    %44 = vector.load %arg6[%c0_15, %c0_16, %c0_17, %c0_18] : memref<2x1x16x16xf32, #tpu.memory_space<vmem>>, vector<1x1x16x16xf32>
    %45 = vector.shape_cast %44 : vector<1x1x16x16xf32> to vector<16x16xf32>
    %46 = vector.shape_cast %35 : vector<16x16xf32> to vector<1x1x16x16xf32>
    tpu.vector_store %arg6[%c0_15, %c0_16, %c0_17, %c0_18], %46 {strides = array<i32>} : memref<2x1x16x16xf32, #tpu.memory_space<vmem>>, vector<1x1x16x16xf32>,
    %47 = vector.extract_strided_slice %34 {offsets = [80, 0], sizes = [16, 16], strides = [1, 1]} : vector<160x16xf32> to vector<16x16xf32>
    %48 = vector.extract_strided_slice %34 {offsets = [96, 0], sizes = [16, 16], strides = [1, 1]} : vector<160x16xf32> to vector<16x16xf32>
    %cst_19 = arith.constant 0.000000e+00 : f32
    %49 = vector.broadcast %cst_19 : f32 to vector<16x16xf32>
    %50 = arith.subf %49, %48 : vector<16x16xf32>
    %51 = vector.extract_strided_slice %34 {offsets = [112, 0], sizes = [16, 16], strides = [1, 1]} : vector<160x16xf32> to vector<16x16xf32>
    %52 = vector.extract_strided_slice %34 {offsets = [128, 0], sizes = [16, 16], strides = [1, 1]} : vector<160x16xf32> to vector<16x16xf32>
    %cst_20 = arith.constant 0.000000e+00 : f32
    %53 = vector.broadcast %cst_20 : f32 to vector<16x16xf32>
    %54 = arith.subf %53, %52 : vector<16x16xf32>
    %55 = vector.extract_strided_slice %34 {offsets = [144, 0], sizes = [16, 16], strides = [1, 1]} : vector<160x16xf32> to vector<16x16xf32>
    %c1 = arith.constant 1 : index
    %c0_21 = arith.constant 0 : index
    %c0_22 = arith.constant 0 : index
    %c0_23 = arith.constant 0 : index
    %56 = vector.load %arg6[%c1, %c0_21, %c0_22, %c0_23] : memref<2x1x16x16xf32, #tpu.memory_space<vmem>>, vector<1x1x16x16xf32>
    %57 = vector.shape_cast %56 : vector<1x1x16x16xf32> to vector<16x16xf32>
    %58 = vector.shape_cast %47 : vector<16x16xf32> to vector<1x1x16x16xf32>
    tpu.vector_store %arg6[%c1, %c0_21, %c0_22, %c0_23], %58 {strides = array<i32>} : memref<2x1x16x16xf32, #tpu.memory_space<vmem>>, vector<1x1x16x16xf32>,
    %59 = arith.index_cast %arg0 : i32 to index
    %60 = memref.load %arg2[%59] : memref<8xi32, #tpu.memory_space<smem>>
    %c0_i32 = arith.constant 0 : i32
    %61 = arith.cmpi ne, %60, %c0_i32 : i32
    %62 = arith.extui %61 : i1 to i32
    %c0_i32_24 = arith.constant 0 : i32
    %63 = arith.cmpi ne, %62, %c0_i32_24 : i32
    scf.if %63 {
      %c0_26 = arith.constant 0 : index
      %c0_27 = arith.constant 0 : index
      %c0_28 = arith.constant 0 : index
      %c0_29 = arith.constant 0 : index
      %c0_30 = arith.constant 0 : index
      %67 = vector.load %arg7[%c0_26, %c0_27, %c0_28, %c0_29, %c0_30] : memref<2x1x2x16x16xf32, #tpu.memory_space<vmem>>, vector<1x1x1x16x16xf32>
      %68 = vector.shape_cast %67 : vector<1x1x1x16x16xf32> to vector<16x16xf32>
      %69 = vector.shape_cast %42 : vector<16x16xf32> to vector<1x1x1x16x16xf32>
      tpu.vector_store %arg7[%c0_26, %c0_27, %c0_28, %c0_29, %c0_30], %69 {strides = array<i32>} : memref<2x1x2x16x16xf32, #tpu.memory_space<vmem>>, vector<1x1x1x16x16xf32>,
      %c0_31 = arith.constant 0 : index
      %c0_32 = arith.constant 0 : index
      %c1_33 = arith.constant 1 : index
      %c0_34 = arith.constant 0 : index
      %c0_35 = arith.constant 0 : index
      %70 = vector.load %arg7[%c0_31, %c0_32, %c1_33, %c0_34, %c0_35] : memref<2x1x2x16x16xf32, #tpu.memory_space<vmem>>, vector<1x1x1x16x16xf32>
      %71 = vector.shape_cast %70 : vector<1x1x1x16x16xf32> to vector<16x16xf32>
      %72 = vector.shape_cast %43 : vector<16x16xf32> to vector<1x1x1x16x16xf32>
      tpu.vector_store %arg7[%c0_31, %c0_32, %c1_33, %c0_34, %c0_35], %72 {strides = array<i32>} : memref<2x1x2x16x16xf32, #tpu.memory_space<vmem>>, vector<1x1x1x16x16xf32>,
      %c0_36 = arith.constant 0 : index
      %c0_37 = arith.constant 0 : index
      %c0_38 = arith.constant 0 : index
      %c0_39 = arith.constant 0 : index
      %c0_40 = arith.constant 0 : index
      %73 = vector.load %arg8[%c0_36, %c0_37, %c0_38, %c0_39, %c0_40] : memref<2x1x2x16x16xf32, #tpu.memory_space<vmem>>, vector<1x1x1x16x16xf32>
      %74 = vector.shape_cast %73 : vector<1x1x1x16x16xf32> to vector<16x16xf32>
      %75 = vector.shape_cast %38 : vector<16x16xf32> to vector<1x1x1x16x16xf32>
      tpu.vector_store %arg8[%c0_36, %c0_37, %c0_38, %c0_39, %c0_40], %75 {strides = array<i32>} : memref<2x1x2x16x16xf32, #tpu.memory_space<vmem>>, vector<1x1x1x16x16xf32>,
      %c0_41 = arith.constant 0 : index
      %c0_42 = arith.constant 0 : index
      %c1_43 = arith.constant 1 : index
      %c0_44 = arith.constant 0 : index
      %c0_45 = arith.constant 0 : index
      %76 = vector.load %arg8[%c0_41, %c0_42, %c1_43, %c0_44, %c0_45] : memref<2x1x2x16x16xf32, #tpu.memory_space<vmem>>, vector<1x1x1x16x16xf32>
      %77 = vector.shape_cast %76 : vector<1x1x1x16x16xf32> to vector<16x16xf32>
      %78 = vector.shape_cast %39 : vector<16x16xf32> to vector<1x1x1x16x16xf32>
      tpu.vector_store %arg8[%c0_41, %c0_42, %c1_43, %c0_44, %c0_45], %78 {strides = array<i32>} : memref<2x1x2x16x16xf32, #tpu.memory_space<vmem>>, vector<1x1x1x16x16xf32>,
      %c1_46 = arith.constant 1 : index
      %c0_47 = arith.constant 0 : index
      %c0_48 = arith.constant 0 : index
      %c0_49 = arith.constant 0 : index
      %c0_50 = arith.constant 0 : index
      %79 = vector.load %arg7[%c1_46, %c0_47, %c0_48, %c0_49, %c0_50] : memref<2x1x2x16x16xf32, #tpu.memory_space<vmem>>, vector<1x1x1x16x16xf32>
      %80 = vector.shape_cast %79 : vector<1x1x1x16x16xf32> to vector<16x16xf32>
      %81 = vector.shape_cast %54 : vector<16x16xf32> to vector<1x1x1x16x16xf32>
      tpu.vector_store %arg7[%c1_46, %c0_47, %c0_48, %c0_49, %c0_50], %81 {strides = array<i32>} : memref<2x1x2x16x16xf32, #tpu.memory_space<vmem>>, vector<1x1x1x16x16xf32>,
      %c1_51 = arith.constant 1 : index
      %c0_52 = arith.constant 0 : index
      %c1_53 = arith.constant 1 : index
      %c0_54 = arith.constant 0 : index
      %c0_55 = arith.constant 0 : index
      %82 = vector.load %arg7[%c1_51, %c0_52, %c1_53, %c0_54, %c0_55] : memref<2x1x2x16x16xf32, #tpu.memory_space<vmem>>, vector<1x1x1x16x16xf32>
      %83 = vector.shape_cast %82 : vector<1x1x1x16x16xf32> to vector<16x16xf32>
      %84 = vector.shape_cast %55 : vector<16x16xf32> to vector<1x1x1x16x16xf32>
      tpu.vector_store %arg7[%c1_51, %c0_52, %c1_53, %c0_54, %c0_55], %84 {strides = array<i32>} : memref<2x1x2x16x16xf32, #tpu.memory_space<vmem>>, vector<1x1x1x16x16xf32>,
      %c1_56 = arith.constant 1 : index
      %c0_57 = arith.constant 0 : index
      %c0_58 = arith.constant 0 : index
      %c0_59 = arith.constant 0 : index
      %c0_60 = arith.constant 0 : index
      %85 = vector.load %arg8[%c1_56, %c0_57, %c0_58, %c0_59, %c0_60] : memref<2x1x2x16x16xf32, #tpu.memory_space<vmem>>, vector<1x1x1x16x16xf32>
      %86 = vector.shape_cast %85 : vector<1x1x1x16x16xf32> to vector<16x16xf32>
      %87 = vector.shape_cast %50 : vector<16x16xf32> to vector<1x1x1x16x16xf32>
      tpu.vector_store %arg8[%c1_56, %c0_57, %c0_58, %c0_59, %c0_60], %87 {strides = array<i32>} : memref<2x1x2x16x16xf32, #tpu.memory_space<vmem>>, vector<1x1x1x16x16xf32>,
      %c1_61 = arith.constant 1 : index
      %c0_62 = arith.constant 0 : index
      %c1_63 = arith.constant 1 : index
      %c0_64 = arith.constant 0 : index
      %c0_65 = arith.constant 0 : index
      %88 = vector.load %arg8[%c1_61, %c0_62, %c1_63, %c0_64, %c0_65] : memref<2x1x2x16x16xf32, #tpu.memory_space<vmem>>, vector<1x1x1x16x16xf32>
      %89 = vector.shape_cast %88 : vector<1x1x1x16x16xf32> to vector<16x16xf32>
      %90 = vector.shape_cast %51 : vector<16x16xf32> to vector<1x1x1x16x16xf32>
      tpu.vector_store %arg8[%c1_61, %c0_62, %c1_63, %c0_64, %c0_65], %90 {strides = array<i32>} : memref<2x1x2x16x16xf32, #tpu.memory_space<vmem>>, vector<1x1x1x16x16xf32>,
    } else {
    }
    %true = arith.constant true
    %64 = arith.xori %61, %true : i1
    %65 = arith.extui %64 : i1 to i32
    %c0_i32_25 = arith.constant 0 : i32
    %66 = arith.cmpi ne, %65, %c0_i32_25 : i32
    scf.if %66 {
      %c0_26 = arith.constant 0 : index
      %c0_27 = arith.constant 0 : index
      %c0_28 = arith.constant 0 : index
      %c0_29 = arith.constant 0 : index
      %c0_30 = arith.constant 0 : index
      %67 = vector.load %arg7[%c0_26, %c0_27, %c0_28, %c0_29, %c0_30] : memref<2x1x2x16x16xf32, #tpu.memory_space<vmem>>, vector<1x1x1x16x16xf32>
      %68 = vector.shape_cast %67 : vector<1x1x1x16x16xf32> to vector<16x16xf32>
      %69 = vector.shape_cast %38 : vector<16x16xf32> to vector<1x1x1x16x16xf32>
      tpu.vector_store %arg7[%c0_26, %c0_27, %c0_28, %c0_29, %c0_30], %69 {strides = array<i32>} : memref<2x1x2x16x16xf32, #tpu.memory_space<vmem>>, vector<1x1x1x16x16xf32>,
      %c0_31 = arith.constant 0 : index
      %c0_32 = arith.constant 0 : index
      %c1_33 = arith.constant 1 : index
      %c0_34 = arith.constant 0 : index
      %c0_35 = arith.constant 0 : index
      %70 = vector.load %arg7[%c0_31, %c0_32, %c1_33, %c0_34, %c0_35] : memref<2x1x2x16x16xf32, #tpu.memory_space<vmem>>, vector<1x1x1x16x16xf32>
      %71 = vector.shape_cast %70 : vector<1x1x1x16x16xf32> to vector<16x16xf32>
      %72 = vector.shape_cast %39 : vector<16x16xf32> to vector<1x1x1x16x16xf32>
      tpu.vector_store %arg7[%c0_31, %c0_32, %c1_33, %c0_34, %c0_35], %72 {strides = array<i32>} : memref<2x1x2x16x16xf32, #tpu.memory_space<vmem>>, vector<1x1x1x16x16xf32>,
      %c0_36 = arith.constant 0 : index
      %c0_37 = arith.constant 0 : index
      %c0_38 = arith.constant 0 : index
      %c0_39 = arith.constant 0 : index
      %c0_40 = arith.constant 0 : index
      %73 = vector.load %arg8[%c0_36, %c0_37, %c0_38, %c0_39, %c0_40] : memref<2x1x2x16x16xf32, #tpu.memory_space<vmem>>, vector<1x1x1x16x16xf32>
      %74 = vector.shape_cast %73 : vector<1x1x1x16x16xf32> to vector<16x16xf32>
      %75 = vector.shape_cast %42 : vector<16x16xf32> to vector<1x1x1x16x16xf32>
      tpu.vector_store %arg8[%c0_36, %c0_37, %c0_38, %c0_39, %c0_40], %75 {strides = array<i32>} : memref<2x1x2x16x16xf32, #tpu.memory_space<vmem>>, vector<1x1x1x16x16xf32>,
      %c0_41 = arith.constant 0 : index
      %c0_42 = arith.constant 0 : index
      %c1_43 = arith.constant 1 : index
      %c0_44 = arith.constant 0 : index
      %c0_45 = arith.constant 0 : index
      %76 = vector.load %arg8[%c0_41, %c0_42, %c1_43, %c0_44, %c0_45] : memref<2x1x2x16x16xf32, #tpu.memory_space<vmem>>, vector<1x1x1x16x16xf32>
      %77 = vector.shape_cast %76 : vector<1x1x1x16x16xf32> to vector<16x16xf32>
      %78 = vector.shape_cast %43 : vector<16x16xf32> to vector<1x1x1x16x16xf32>
      tpu.vector_store %arg8[%c0_41, %c0_42, %c1_43, %c0_44, %c0_45], %78 {strides = array<i32>} : memref<2x1x2x16x16xf32, #tpu.memory_space<vmem>>, vector<1x1x1x16x16xf32>,
      %c1_46 = arith.constant 1 : index
      %c0_47 = arith.constant 0 : index
      %c0_48 = arith.constant 0 : index
      %c0_49 = arith.constant 0 : index
      %c0_50 = arith.constant 0 : index
      %79 = vector.load %arg7[%c1_46, %c0_47, %c0_48, %c0_49, %c0_50] : memref<2x1x2x16x16xf32, #tpu.memory_space<vmem>>, vector<1x1x1x16x16xf32>
      %80 = vector.shape_cast %79 : vector<1x1x1x16x16xf32> to vector<16x16xf32>
      %81 = vector.shape_cast %50 : vector<16x16xf32> to vector<1x1x1x16x16xf32>
      tpu.vector_store %arg7[%c1_46, %c0_47, %c0_48, %c0_49, %c0_50], %81 {strides = array<i32>} : memref<2x1x2x16x16xf32, #tpu.memory_space<vmem>>, vector<1x1x1x16x16xf32>,
      %c1_51 = arith.constant 1 : index
      %c0_52 = arith.constant 0 : index
      %c1_53 = arith.constant 1 : index
      %c0_54 = arith.constant 0 : index
      %c0_55 = arith.constant 0 : index
      %82 = vector.load %arg7[%c1_51, %c0_52, %c1_53, %c0_54, %c0_55] : memref<2x1x2x16x16xf32, #tpu.memory_space<vmem>>, vector<1x1x1x16x16xf32>
      %83 = vector.shape_cast %82 : vector<1x1x1x16x16xf32> to vector<16x16xf32>
      %84 = vector.shape_cast %51 : vector<16x16xf32> to vector<1x1x1x16x16xf32>
      tpu.vector_store %arg7[%c1_51, %c0_52, %c1_53, %c0_54, %c0_55], %84 {strides = array<i32>} : memref<2x1x2x16x16xf32, #tpu.memory_space<vmem>>, vector<1x1x1x16x16xf32>,
      %c1_56 = arith.constant 1 : index
      %c0_57 = arith.constant 0 : index
      %c0_58 = arith.constant 0 : index
      %c0_59 = arith.constant 0 : index
      %c0_60 = arith.constant 0 : index
      %85 = vector.load %arg8[%c1_56, %c0_57, %c0_58, %c0_59, %c0_60] : memref<2x1x2x16x16xf32, #tpu.memory_space<vmem>>, vector<1x1x1x16x16xf32>
      %86 = vector.shape_cast %85 : vector<1x1x1x16x16xf32> to vector<16x16xf32>
      %87 = vector.shape_cast %54 : vector<16x16xf32> to vector<1x1x1x16x16xf32>
      tpu.vector_store %arg8[%c1_56, %c0_57, %c0_58, %c0_59, %c0_60], %87 {strides = array<i32>} : memref<2x1x2x16x16xf32, #tpu.memory_space<vmem>>, vector<1x1x1x16x16xf32>,
      %c1_61 = arith.constant 1 : index
      %c0_62 = arith.constant 0 : index
      %c1_63 = arith.constant 1 : index
      %c0_64 = arith.constant 0 : index
      %c0_65 = arith.constant 0 : index
      %88 = vector.load %arg8[%c1_61, %c0_62, %c1_63, %c0_64, %c0_65] : memref<2x1x2x16x16xf32, #tpu.memory_space<vmem>>, vector<1x1x1x16x16xf32>
      %89 = vector.shape_cast %88 : vector<1x1x1x16x16xf32> to vector<16x16xf32>
      %90 = vector.shape_cast %55 : vector<16x16xf32> to vector<1x1x1x16x16xf32>
      tpu.vector_store %arg8[%c1_61, %c0_62, %c1_63, %c0_64, %c0_65], %90 {strides = array<i32>} : memref<2x1x2x16x16xf32, #tpu.memory_space<vmem>>, vector<1x1x1x16x16xf32>,
    } else {
    }
    return
  }
  func.func @transform_0(%arg0: i32, %arg1: memref<8xi32, #tpu.memory_space<smem>>, %arg2: memref<8xi32, #tpu.memory_space<smem>>) -> (i32, i32, i32, i32) {
    %0 = arith.index_cast %arg0 : i32 to index
    %1 = memref.load %arg1[%0] : memref<8xi32, #tpu.memory_space<smem>>
    %c0_i32 = arith.constant 0 : i32
    %c0_i32_0 = arith.constant 0 : i32
    %c0_i32_1 = arith.constant 0 : i32
    %c0_i32_2 = arith.constant 0 : i32
    return %c0_i32, %1, %c0_i32_0, %c0_i32_1 : i32, i32, i32, i32
  }
  func.func @transform_1(%arg0: i32, %arg1: memref<8xi32, #tpu.memory_space<smem>>, %arg2: memref<8xi32, #tpu.memory_space<smem>>) -> (i32, i32, i32, i32, i32) {
    %0 = arith.index_cast %arg0 : i32 to index
    %1 = memref.load %arg1[%0] : memref<8xi32, #tpu.memory_space<smem>>
    %c0_i32 = arith.constant 0 : i32
    %c0_i32_0 = arith.constant 0 : i32
    %c0_i32_1 = arith.constant 0 : i32
    %c0_i32_2 = arith.constant 0 : i32
    %c0_i32_3 = arith.constant 0 : i32
    return %c0_i32, %1, %c0_i32_0, %c0_i32_1, %c0_i32_2 : i32, i32, i32, i32, i32
  }
  func.func @transform_2(%arg0: i32, %arg1: memref<8xi32, #tpu.memory_space<smem>>, %arg2: memref<8xi32, #tpu.memory_space<smem>>) -> (i32, i32, i32, i32, i32) {
    %0 = arith.index_cast %arg0 : i32 to index
    %1 = memref.load %arg1[%0] : memref<8xi32, #tpu.memory_space<smem>>
    %c0_i32 = arith.constant 0 : i32
    %c0_i32_0 = arith.constant 0 : i32
    %c0_i32_1 = arith.constant 0 : i32
    %c0_i32_2 = arith.constant 0 : i32
    %c0_i32_3 = arith.constant 0 : i32
    return %c0_i32, %1, %c0_i32_0, %c0_i32_1, %c0_i32_2 : i32, i32, i32, i32, i32
  }
  func.func @transform_3(%arg0: i32, %arg1: memref<8xi32, #tpu.memory_space<smem>>, %arg2: memref<8xi32, #tpu.memory_space<smem>>) -> (i32, i32, i32, i32) {
    %c0_i32 = arith.constant 0 : i32
    %c0_i32_0 = arith.constant 0 : i32
    %c0_i32_1 = arith.constant 0 : i32
    %c0_i32_2 = arith.constant 0 : i32
    return %c0_i32, %arg0, %c0_i32_0, %c0_i32_1 : i32, i32, i32, i32
  }
  func.func @transform_4(%arg0: i32, %arg1: memref<8xi32, #tpu.memory_space<smem>>, %arg2: memref<8xi32, #tpu.memory_space<smem>>) -> (i32, i32, i32, i32, i32) {
    %c0_i32 = arith.constant 0 : i32
    %c0_i32_0 = arith.constant 0 : i32
    %c0_i32_1 = arith.constant 0 : i32
    %c0_i32_2 = arith.constant 0 : i32
    %c0_i32_3 = arith.constant 0 : i32
    return %c0_i32, %arg0, %c0_i32_0, %c0_i32_1, %c0_i32_2 : i32, i32, i32, i32, i32
  }
  func.func @transform_5(%arg0: i32, %arg1: memref<8xi32, #tpu.memory_space<smem>>, %arg2: memref<8xi32, #tpu.memory_space<smem>>) -> (i32, i32, i32, i32, i32) {
    %c0_i32 = arith.constant 0 : i32
    %c0_i32_0 = arith.constant 0 : i32
    %c0_i32_1 = arith.constant 0 : i32
    %c0_i32_2 = arith.constant 0 : i32
    %c0_i32_3 = arith.constant 0 : i32
    return %c0_i32, %arg0, %c0_i32_0, %c0_i32_1, %c0_i32_2 : i32, i32, i32, i32, i32
  }
}

</mosaic_0001>

<bundles_post_ra>
// kernel: tpu_custom_call.1
= control target key start
LH: loop header
LB: loop body
LE: loop exit
PB: predicated region body
PF: predicated region fallthrough
CT: control target
= control target key end

     0   :  { %s1455_s30 = smov [#allocation3]   ;;  %s1456_s8 = smov [#allocation4]   ;;  %s2052_s0 = inlined_call_operand.hbm [shape: s32[8], index: 0, kind: input, shape index: {}]   ;;  %s2053_s2 = inlined_call_operand.hbm [shape: f32[2,8,16,16], index: 2, kind: input, shape index: {}]   ;;  %s2054_s3 = inlined_call_operand.hbm [shape: f32[2,8,2,16,16], index: 3, kind: input, shape index: {}]   ;;  %s2055_s4 = inlined_call_operand.hbm [shape: f32[2,8,2,16,16], index: 4, kind: input, shape index: {}]   ;;  %s2056_s5 = inlined_call_operand.hbm [shape: f32[2,8,16,16], index: 5, kind: output, shape index: {0}]   ;;  %s2057_s6 = inlined_call_operand.hbm [shape: f32[2,8,2,16,16], index: 6, kind: output, shape index: {1}]   ;;  %s2058_s7 = inlined_call_operand.hbm [shape: f32[2,8,2,16,16], index: 7, kind: output, shape index: {2}]   ;;  %s2059_s1 = inlined_call_operand.hbm [shape: s32[8], index: 1, kind: input, shape index: {}]  }
   0x1   :  { %2072 = sst [smem:[#allocation51_spill]] %s2056_s5  ;;  %s14_s26 = sshll.u32 %s2052_s0, 4  ;;  %s15_s26 = int_to_ptr.hbm [resolvable:$true] %s14_s26 }
   0x2   :  { %2073 = sst [smem:[#allocation52_spill]] %s2057_s6  ;;  %s19_s29 = sshll.u32 %s2059_s1, 4  ;;  %s20_s29 = int_to_ptr.hbm [resolvable:$true] %s19_s29 }
   0x3   :  { %2074 = sst [smem:[#allocation53_spill]] %s2058_s7 }
   0x4   :  { %17 = dma.hbm_to_smem %s15_s26, 16, %s1455_s30, [#allocation2] }
   0x5   :  { %22 = dma.hbm_to_smem %s20_s29, 16, %s1456_s8, [#allocation2] }
   0x6   :  { %1381 = dma.done.wait [#allocation2], 32 }
   0x7   :  { %1382 = vsyncadd [#allocation2], 4294967264 }
   0x8   :  { %25 = sfence }
   0x9   :  { %26 = vsyncpa [#allocation6], 0 }
   0xa   :  { %28 = vsyncpa [#allocation6 + $0x1], 0 }
   0xb   :  { %29 = vsyncpa [#allocation9], 0 }
   0xc   :  { %31 = vsyncpa [#allocation9 + $0x1], 0 }
   0xd   :  { %32 = vsyncpa [#allocation7], 0 }
   0xe   :  { %34 = vsyncpa [#allocation7 + $0x1], 0 }
   0xf   :  { %35 = vsyncpa [#allocation13], 0 }
  0x10   :  { %37 = vsyncpa [#allocation13 + $0x1], 0  ;;  %s1543_s0 = smov 0   ;;  %s1545_s1 = smov 0  }
  0x11   :  { %s1547_s9 = smov 0   ;;  %s1549_s10 = smov 0  }
  0x12   :  { %s1551_s11 = smov 0   ;;  %s1553_s12 = smov 0  }
  0x13   :  { %s1555_s13 = smov 0   ;;  %s1557_s14 = smov 0  }
  0x14   :  { %s1559_s15 = smov 0   ;;  %s1561_s16 = smov 0  }
  0x15   :  { %s1563_s17 = smov 0   ;;  %s1565_s18 = smov 0  }
  0x16   :  { %s1567_s19 = smov 0  }
  0x17 LB: > { %2075 = sst [smem:[#allocation39_spill]] %s1405_s0  ;;  %s1605_s20 = sadd.s32 4294967295, %s1453_s19   ;;  %s1453_s19 = sphi %s1567_s19, %s2106_s19   ;;  %s1449_s18 = sphi %s1565_s18, %s2113_s18   ;;  %s1445_s17 = sphi %s1563_s17, %s2122_s17   ;;  %s1441_s16 = sphi %s1561_s16, %s2121_s16   ;;  %s1437_s15 = sphi %s1559_s15, %s2120_s15   ;;  %s1433_s14 = sphi %s1557_s14, %s2119_s14   ;;  %s1429_s13 = sphi %s1555_s13, %s2118_s13   ;;  %s1425_s12 = sphi %s1553_s12, %s2117_s12   ;;  %s1421_s11 = sphi %s1551_s11, %s2116_s11   ;;  %s1417_s10 = sphi %s1549_s10, %s2115_s10   ;;  %s1413_s9 = sphi %s1547_s9, %s2109_s9   ;;  %s1409_s1 = sphi %s1545_s1, %s2108_s1   ;;  %s1405_s0 = sphi %s1543_s0, %s2107_s0  }
  0x18   : > { %2076 = sst [smem:[#allocation40_spill]] %s1409_s1  ;;  %s1609_s22 = sadd.s32 1, %s1453_s19  }
  0x19   : > { %2077 = sst [smem:[#allocation41_spill]] %s1413_s9  ;;  %s52_s25 = sadd.s32 1, %s1449_s18 }
  0x1a   : > { %2078 = sst [smem:[#allocation42_spill]] %s1449_s18  ;;  %p59_p0 = scmp.ne.s32.totalorder %s1449_s18, %s1445_s17 }
  0x1b   : > { %2079 = sst [smem:[#allocation43_spill]] %s1609_s22  ;;  %p60_p1 = scmp.eq.s32.totalorder %s1453_s19, 0 }
  0x1c   : > { %s47_s23 = sld [smem:[#allocation3 + %s1453_s19]]  ;;  %p65_p2 = scmp.ne.s32.totalorder %s1445_s17, %s1441_s16 }
  0x1d   : > { %s48_s24 = sld [smem:[#allocation3 + %s1609_s22]]  ;;  %p66_p3 = scmp.eq.s32.totalorder %s1605_s20, 0 }
  0x1e   : > { %p1621_p4 = por %p60_p1, %p59_p0  ;;  %s75_s27 = sld [smem:[#allocation3 + %s1453_s19]] }
  0x1f   : > { %p1628_p5 = por %p66_p3, %p65_p2  ;;  %s76_s29 = sld [smem:[#allocation3 + %s1609_s22]] }
  0x20   : > { %s80_s30 = sadd.s32 1, %s1437_s15  ;;  %p87_p6 = scmp.ne.s32.totalorder %s1437_s15, %s1433_s14 }
  0x21   : > { %p93_p7 = scmp.ne.s32.totalorder %s1433_s14, %s1429_s13  ;;  %s103_s7 = sld [smem:[#allocation3 + %s1453_s19]] }
  0x22   : > { %p1639_p9 = por %p87_p6, %p60_p1  ;;  %s104_s13 = sld [smem:[#allocation3 + %s1609_s22]] }
  0x23   : > { %s49_s8 = ssub.s32 %s47_s23, %s48_s24  ;;  %p1645_p10 = por %p93_p7, %p66_p3 }
  0x24   : > { %p50_p8 = scmp.eq.s32.totalorder %s49_s8, 0  ;;  %s108_s24 = sadd.s32 1, %s1425_s12 }
  0x25   : > { %s2083_s21 = scalar_select %p1645_p10, 1, 0 }
  0x26   : > { %s1651_s6 = scalar_select %p50_p8, %s1449_s18, %s52_s25  }
  0x27   : > { %s77_s23 = ssub.s32 %s75_s27, %s76_s29  ;;  %p115_p12 = scmp.ne.s32.totalorder %s1425_s12, %s1421_s11 }
  0x28   : > { %2084 = sst [smem:[#allocation44_spill]] %s1651_s6  ;;  %p78_p11 = scmp.eq.s32.totalorder %s77_s23, 0 }
  0x29   : > { %p121_p13 = scmp.ne.s32.totalorder %s1421_s11, %s1417_s10  ;;  %p1664_p0 = por %p115_p12, %p60_p1 }
  0x2a   : > { %s1660_s8 = scalar_select %p78_p11, %s1437_s15, %s80_s30  }
  0x2b   : > { %p1670_p2 = por %p121_p13, %p66_p3  ;;  %s131_s27 = ssub.s32 %s1453_s19, %s1609_s22 }
  0x2c   : > { %2085 = sst [smem:[#allocation45_spill]] %s1660_s8  ;;  %s134_s29 = sadd.s32 1, %s1413_s9 }
  0x2d   : > { %s2087_s25 = scalar_select %p1670_p2, 1, 0 }
  0x2e   : > { %s105_s23 = ssub.s32 %s103_s7, %s104_s13  ;;  %p132_p6 = scmp.eq.s32.totalorder %s131_s27, 0 }
  0x2f   : > { %2088 = sst [smem:[#allocation46_spill]] %s2087_s25  ;;  %p106_p7 = scmp.eq.s32.totalorder %s105_s23, 0 }
  0x30   : > { %p144_p8 = scmp.ne.s32.totalorder %s1413_s9, %s1409_s1  ;;  %p145_p11 = scmp.eq.s32.totalorder %s1605_s20, 7 }
  0x31   : > { %s1680_s6 = scalar_select %p132_p6, %s1413_s9, %s134_s29  }
  0x32   : > { %s1683_s10 = scalar_select %p106_p7, %s1425_s12, %s108_s24  }
  0x33   : > { %2089 = sst [smem:[#allocation47_spill]] %s1680_s6  ;;  %p150_p1 = scmp.ne.s32.totalorder %s1409_s1, %s1405_s0 }
  0x34   : > { %2090 = sst [smem:[#allocation48_spill]] %s1683_s10  ;;  %s2091_s30 = sadd.s32 4294967294, %s1453_s19  }
  0x35   : > { %p151_p12 = scmp.eq.s32.totalorder %s2091_s30, 7  ;;  %p1690_p10 = por %p145_p11, %p144_p8 }
  0x36   : > { %p993_p13 = scmp.ge.s32.totalorder %s1453_s19, 8 }
  0x37   : > { %s2092_s8 = scalar_select %p1690_p10, 1, 0 }
  0x38   : > { %p1694_p3 = por %p151_p12, %p150_p1  ;;  %219 = sbr.rel (%p993_p13) target bundleno = 110 (0x6e), region = 16 }
  0x39   : > { %2093 = sst [smem:[#allocation49_spill]] %s2092_s8 }
  0x3a   : > { %s2094_s25 = scalar_select %p1694_p3, 1, 0 }
  0x3c   : > { %2095 = sst [smem:[#allocation50_spill]] %s2094_s25 }
  0x3d   : > { %s223_s7 = sand.u32 1, %s1449_s18   ;;  %s1457_s24 = smov 2048  }
  0x3e   : > { %s994_s13 = sshll.u32 %s223_s7, 5  ;;  %1094 = sst [smem:[#allocation16]] (%p1621_p4), %s1457_s24 }
  0x3f   : > { %s1091_s27 = scalar_select %p1621_p4, [#allocation3], [#allocation27] }
  0x40   : > { %s1092_s29 = scalar_select %p1621_p4, %s1453_s19, 0 }
  0x41   : > { %s1093_s23 = scalar_select %p1621_p4, [#allocation0], [#allocation28] }
  0x42   : > { %s228_s30 = sld [smem:[%s1091_s27 + %s1092_s29]]  ;;  %s227_s10 = scalar_lea.vmem [#allocation5], %s994_s13 }
  0x43   : > { %s248_s6 = sshll.u32 %s227_s10, 4  ;;  %s238_s9 = sld [smem:[%s1093_s23]]   ;;  %s249_s6 = int_to_ptr.vmem [resolvable:$true] %s248_s6 }
  0x44   : > { %s1458_s22 = smov 256   ;;  %s1459_s18 = smov 2  }
  0x45   : > { %1095 = sst [smem:[#allocation16 + $0x1]] (%p1621_p4), %s1458_s22  ;;  %s1460_s24 = smov 128  }
  0x46   : > { %1096 = sst [smem:[#allocation16 + $0x2]] (%p1621_p4), %s1459_s18  ;;  %s1461_s8 = smov 8  }
  0x47   : > { %1097 = sst [smem:[#allocation16 + $0x3]] (%p1621_p4), %s1460_s24  ;;  %s224_s22 = scalar_lea.sflag [#allocation6], %s223_s7 }
  0x48   : > { %s1079_s25 = sshll.u32 %s228_s30, 4  ;;  %1098 = sst [smem:[#allocation16 + $0x4]] (%p1621_p4), %s1460_s24 }
  0x49   : > { %s233_s10 = scalar_lea.hbm %s2053_s2, %s1079_s25  ;;  %s997_s13 = sshll.u32 %s238_s9, 26 }
  0x4a   : > { %s998_s29 = sadd.s32 134217728, %s997_s13  ;;  %s246_s23 = sshll.u32 %s233_s10, 4  ;;  %s247_s23 = int_to_ptr.hbm [resolvable:$true] %s246_s23 }
  0x4b   : > { %1099 = sst [smem:[#allocation16 + $0x5]] (%p1621_p4), %s1461_s8  ;;  %s1462_s1 = smov [#allocation15]  }
  0x4c   : > { %1100 = dma.general (%p1621_p4), %s247_s23, 512, %s249_s6, %s224_s22, %s1462_s1, [#allocation16], %s998_s29, 0  }
  0x4d   : > { %s271_s0 = sand.u32 1, %s1453_s19   ;;  %s273_s9 = sand.u32 1, %s1437_s15  }
  0x4e   : > { %s999_s18 = sshll.u32 %s273_s9, 6  ;;  %s1463_s24 = smov 4096  }
  0x4f   : > { %s1101_s25 = scalar_select %p1639_p9, [#allocation3], [#allocation29] }
  0x50   : > { %s1102_s8 = scalar_select %p1639_p9, %s1453_s19, 0 }
  0x51   : > { %s1103_s6 = scalar_select %p1639_p9, [#allocation0], [#allocation30] }
  0x52   : > { %s276_s1 = sld [smem:[%s1101_s25 + %s1102_s8]]  ;;  %s275_s26 = scalar_lea.vmem [#allocation8], %s999_s18 }
  0x53   : > { %s296_s7 = sshll.u32 %s275_s26, 4  ;;  %s286_s30 = sld [smem:[%s1103_s6]]   ;;  %s297_s7 = int_to_ptr.vmem [resolvable:$true] %s296_s7 }
  0x54   : > { %1104 = sst [smem:[#allocation18]] (%p1639_p9), %s1463_s24  ;;  %s1464_s27 = smov 512  }
  0x55   : > { %1105 = sst [smem:[#allocation18 + $0x1]] (%p1639_p9), %s1464_s27  ;;  %s1465_s10 = smov 4  }
  0x56   : > { %1106 = sst [smem:[#allocation18 + $0x2]] (%p1639_p9), %s1465_s10  ;;  %s1466_s13 = smov 128  }
  0x57   : > { %1107 = sst [smem:[#allocation18 + $0x3]] (%p1639_p9), %s1466_s13  ;;  %s1467_s6 = smov 8  }
  0x58   : > { %s1080_s29 = sshll.u32 %s276_s1, 5  ;;  %1108 = sst [smem:[#allocation18 + $0x4]] (%p1639_p9), %s1466_s13 }
  0x59   : > { %s281_s9 = scalar_lea.hbm %s2054_s3, %s1080_s29  ;;  %s1002_s18 = sshll.u32 %s286_s30, 26 }
  0x5a   : > { %s1003_s25 = sadd.s32 134217728, %s1002_s18  ;;  %s294_s8 = sshll.u32 %s281_s9, 4  ;;  %s295_s8 = int_to_ptr.hbm [resolvable:$true] %s294_s8 }
  0x5b   : > { %1109 = sst [smem:[#allocation18 + $0x5]] (%p1639_p9), %s1467_s6  ;;  %s1748_s26 = scalar_lea.sflag [#allocation9], %s271_s0 }
  0x5c   : > { %s1468_s24 = smov [#allocation17]  }
  0x5d   : > { %1110 = dma.general (%p1639_p9), %s295_s8, 1024, %s297_s7, %s1748_s26, %s1468_s24, [#allocation18], %s1003_s25, 0  }
  0x5e   : > { %s321_s1 = sand.u32 1, %s1425_s12   ;;  %s1469_s27 = smov 4096  }
  0x5f   : > { %s1004_s30 = sshll.u32 %s321_s1, 6  ;;  %1114 = sst [smem:[#allocation20]] (%p1664_p0), %s1469_s27 }
  0x60   : > { %s1111_s0 = scalar_select %p1664_p0, [#allocation3], [#allocation31] }
  0x61   : > { %s1112_s16 = scalar_select %p1664_p0, %s1453_s19, 0 }
  0x62   : > { %s1113_s7 = scalar_select %p1664_p0, [#allocation0], [#allocation32] }
  0x63   : > { %s324_s10 = sld [smem:[%s1111_s0 + %s1112_s16]]  ;;  %s323_s13 = scalar_lea.vmem [#allocation10], %s1004_s30 }
  0x64   : > { %s344_s29 = sshll.u32 %s323_s13, 4  ;;  %s334_s23 = sld [smem:[%s1113_s7]]   ;;  %s345_s29 = int_to_ptr.vmem [resolvable:$true] %s344_s29 }
  0x65   : > { %s1470_s22 = smov 512   ;;  %s1471_s9 = smov 4  }
  0x66   : > { %1115 = sst [smem:[#allocation20 + $0x1]] (%p1664_p0), %s1470_s22  ;;  %s1472_s18 = smov 128  }
  0x67   : > { %1116 = sst [smem:[#allocation20 + $0x2]] (%p1664_p0), %s1471_s9  ;;  %s1473_s8 = smov 8  }
  0x68   : > { %1117 = sst [smem:[#allocation20 + $0x3]] (%p1664_p0), %s1472_s18  ;;  %s1474_s16 = smov [#allocation19]  }
  0x69   : > { %1118 = sst [smem:[#allocation20 + $0x4]] (%p1664_p0), %s1472_s18  ;;  %s1081_s25 = sshll.u32 %s324_s10, 5 }
  0x6a   : > { %1119 = sst [smem:[#allocation20 + $0x5]] (%p1664_p0), %s1473_s8  ;;  %s329_s1 = scalar_lea.hbm %s2055_s4, %s1081_s25 }
  0x6b   : > { %s1007_s30 = sshll.u32 %s334_s23, 26  ;;  %s342_s0 = sshll.u32 %s329_s1, 4  ;;  %s343_s0 = int_to_ptr.hbm [resolvable:$true] %s342_s0 }
  0x6c   : > { %s1008_s27 = sadd.s32 134217728, %s1007_s30 }
  0x6d   : > { %1120 = dma.general (%p1664_p0), %s343_s0, 1024, %s345_s29, %s1748_s26, %s1474_s16, [#allocation20], %s1008_s27, 0  }
  0x6e PF: > { %p1009_p4 = scmp.ge.s32.totalorder %s1453_s19, 1  ;;  %p365_p9 = scmp.lt.s32.totalorder %s1453_s19, 9 }
  0x70   : > { %p366_p6 = pnand %p1009_p4, %p365_p9 }
  0x71   : > { %s371_s7 = sand.u32 (!%p366_p6), 1, %s1445_s17  }
  0x72   : > { %369 = sbr.rel (%p366_p6) target bundleno = 375 (0x177), region = 32  ;;  %s1010_s10 = sshll.u32 (!%p366_p6), %s371_s7, 5 }
  0x73   : > { %s372_s13 = scalar_lea.sflag (!%p366_p6), [#allocation6], %s371_s7  ;;  %s1782_s22 = scalar_lea.vmem (!%p366_p6), [#allocation5], %s1010_s10 }
  0x77   : > { %1384 = dma.done.wait (%p1628_p5), %s372_s13, 512  }
  0x78   : > { %1386 = vsyncadd (%p1628_p5), %s372_s13, 4294966784  ;;  %s381_s5 = sand.u32 1, %s1605_s20   ;;  %s383_s26 = sand.u32 1, %s1433_s14  }
  0x79   : > { %s1011_s29 = sshll.u32 %s383_s26, 6  ;;  %s382_s23 = scalar_lea.sflag [#allocation9], %s381_s5 }
  0x7a   : > { %s1792_s9 = scalar_lea.vmem [#allocation8], %s1011_s29  ;;  %p2096_p0 = scmp.ne.s32.totalorder %s2083_s21, 0 }
  0x7c   : > { %1388 = dma.done.wait (%p2096_p0), %s382_s23, 1024  }
  0x7d   : > { %1390 = vsyncadd (%p2096_p0), %s382_s23, 4294966272  ;;  %s393_s28 = sand.u32 1, %s1421_s11  }
  0x7e   : > { %s1012_s25 = sshll.u32 %s393_s28, 6 }
  0x7f   : > { %s1799_s8 = scalar_lea.vmem [#allocation10], %s1012_s25 }
  0x80   : > { %1392 = dma.done.wait (%p1670_p2), %s382_s23, 1024  }
  0x81   : > { %1394 = vsyncadd (%p1670_p2), %s382_s23, 4294966272  ;;  %s2098_s6 = sld [smem:[#allocation40_spill]]  ;;  %v446_v0 = vlaneseq  ;;  %v1475_v6 = vmov 1.0   ;;  %v461_v7 = vld [vmem:[%s1782_s22 + $0x10] sm:$0xff]  ;;  %vm479_vm2 = vcmask 130048   ;;  %v470_v8 = vld [vmem:[%s1792_s9 + $0x38] sm:$0xff] }
  0x82   : > { %s1806_s24 = sld [smem:[#allocation4 + %s1605_s20]]  ;;  %v459_v9 = vld [vmem:[%s1782_s22] sm:$0xff]  ;;  %v466_v10 = vld [vmem:[%s1792_s9 + $0x18] sm:$0xff]  ;;  %v460_v13 = vld [vmem:[%s1782_s22 + $0x8] sm:$0xff] }
  0x83   : > { %v447_v1 = vshrl.u32 %v446_v0, 7  ;;  %v450_v2 = vand.u32 127, %v446_v0  ;;  %v462_v11 = vld [vmem:[%s1782_s22 + $0x18] sm:$0xff]  ;;  %v475_v12 = vld [vmem:[%s1799_s8 + $0x20] sm:$0xff]  ;;  %v476_v16 = vld [vmem:[%s1799_s8 + $0x28] sm:$0xff] }
  0x84   : > { %v471_v14 = vld [vmem:[%s1799_s8] sm:$0xff]  ;;  %v472_v18 = vld [vmem:[%s1799_s8 + $0x8] sm:$0xff]  ;;  %v477_v20 = vld [vmem:[%s1799_s8 + $0x30] sm:$0xff] }
  0x85   : > { %v448_v3 = vadd.s32 8, %v447_v1  ;;  %v451_v4 = vadd.s32 %v450_v2, %v447_v1  ;;  %v467_v15 = vld [vmem:[%s1792_s9 + $0x20] sm:$0xff]  ;;  %v468_v19 = vld [vmem:[%s1792_s9 + $0x28] sm:$0xff]  ;;  %v473_v22 = vld [vmem:[%s1799_s8 + $0x10] sm:$0xff] }
  0x86   : > { %v463_v17 = vld [vmem:[%s1792_s9] sm:$0xff]  ;;  %v464_v21 = vld [vmem:[%s1792_s9 + $0x8] sm:$0xff]  ;;  %v469_v23 = vld [vmem:[%s1792_s9 + $0x30] sm:$0xff] }
  0x87   : > { %s1809_s21 = sand.u32 1, %s2098_s6   ;;  %v452_v5 = vadd.s32 %v450_v2, %v448_v3  ;;  %vm453_vm1 = vcmp.eq.s32.totalorder %v451_v4, 15  ;;  %v478_v24 = vld [vmem:[%s1799_s8 + $0x38] sm:$0xff]  ;;  %v465_v25 = vld [vmem:[%s1792_s9 + $0x10] sm:$0xff] }
  0x88   : > { %s1014_s1 = sshll.u32 %s1809_s21, 6  ;;  %v474_v26 = vld [vmem:[%s1799_s8 + $0x18] sm:$0xff]  ;;  %s1013_s30 = sshll.u32 %s1809_s21, 5 }
  0x89   : > { %vm454_vm0 = vcmp.eq.s32.totalorder %v452_v5, 15  ;;  %s1857_s27 = scalar_lea.vmem [#allocation11], %s1013_s30  ;;  %s1869_s0 = scalar_lea.vmem [#allocation12], %s1014_s1 }
  0x8a   : > { %1086 = vmatpush.msk.msra.mxu2 %vm454_vm0, %v1475_v6  ;;  %1087 = vmatpush.msk.msra.mxu3 %vm454_vm0, %v1475_v6  ;;  %s1873_s16 = scalar_lea.vmem [#allocation14], %s1014_s1  ;;  %p1042_p5 = scmp.eq.s32.totalorder %s1806_s24, 0 }
  0x8b   : > { %1018 = vmatpush.msk.msra.mxu0 %vm454_vm0, %v1475_v6  ;;  %1085 = vmatpush.msk.msra.mxu1 %vm454_vm0, %v1475_v6 }
  0x8c   : > { %1089 = vmatpush.msk.msra.mxu2 %vm453_vm1, %v1475_v6  ;;  %1090 = vmatpush.msk.msra.mxu3 %vm453_vm1, %v1475_v6 }
  0x8d   : > { %1030 = vmatmul.msk.f32.vlgmr.msra.gmra.mxu2 %vm479_vm2, %v461_v7  ;;  %1035 = vmatmul.msk.f32.vlgmr.msra.gmra.mxu3 %vm479_vm2, %v470_v8 }
  0x8e   : > { %1019 = vmatpush.msk.msra.mxu0 %vm453_vm1, %v1475_v6  ;;  %1088 = vmatpush.msk.msra.mxu1 %vm453_vm1, %v1475_v6 }
  0x8f   : > { %1020 = vmatmul.msk.f32.vlgmr.msra.gmra.mxu0 %vm479_vm2, %v459_v9  ;;  %1025 = vmatmul.msk.f32.vlgmr.msra.gmra.mxu1 %vm479_vm2, %v466_v10 }
  0x95   : > { %1031 = vmatmul.msk.f32.gmra.mxu2 %vm479_vm2, %v462_v11  ;;  %1036 = vmatmul.msk.f32.gmra.mxu3 %vm479_vm2, %v475_v12 }
  0x97   : > { %1021 = vmatmul.msk.f32.gmra.mxu0 %vm479_vm2, %v460_v13  ;;  %1026 = vmatmul.msk.f32.gmra.mxu1 %vm479_vm2, %v471_v14 }
  0x9d   : > { %1032 = vmatmul.msk.f32.gmra.mxu2 %vm479_vm2, %v467_v15  ;;  %1037 = vmatmul.msk.f32.gmra.mxu3 %vm479_vm2, %v476_v16 }
  0x9f   : > { %1022 = vmatmul.msk.f32.gmra.mxu0 %vm479_vm2, %v463_v17  ;;  %1027 = vmatmul.msk.f32.gmra.mxu1 %vm479_vm2, %v472_v18 }
  0xa5   : > { %1033 = vmatmul.msk.f32.gmra.mxu2 %vm479_vm2, %v468_v19  ;;  %1038 = vmatmul.msk.f32.gmra.mxu3 %vm479_vm2, %v477_v20 }
  0xa7   : > { %1023 = vmatmul.msk.f32.gmra.mxu0 %vm479_vm2, %v464_v21  ;;  %1028 = vmatmul.msk.f32.gmra.mxu1 %vm479_vm2, %v473_v22 }
  0xad   : > { %1034 = vmatmul.msk.f32.gmra.mxu2 %vm479_vm2, %v469_v23  ;;  %1039 = vmatmul.msk.f32.gmra.mxu3 %vm479_vm2, %v478_v24 }
  0xaf   : > { %1024 = vmatmul.msk.f32.gmra.mxu0 %vm479_vm2, %v465_v25  ;;  %1029 = vmatmul.msk.f32.gmra.mxu1 %vm479_vm2, %v474_v26 }
 0x10c   : > { %v557_v27 = vpop.f32.mrf.mxu0  ;;  %v572_v28 = vpop.f32.mrf.mxu1 }
 0x10d   : > { %621 = vst.msk [vmem:[%s1857_s27] sm:$0xff] %vm479_vm2, %v557_v27 }
 0x110   : > { %v587_v29 = vpop.f32.mrf.mxu2  ;;  %v602_v30 = vpop.f32.mrf.mxu3 }
 0x111   : > { %1040 = vst.msk [vmem:[%s1857_s27 + $0x10] sm:$0xff] %vm479_vm2, %v587_v29 }
 0x114   : > { %v560_v31 = vpop.f32.mrf.mxu0  ;;  %v575_v32 = vpop.f32.mrf.mxu1 }
 0x115   : > { %622 = vst.msk [vmem:[%s1857_s27 + $0x8] sm:$0xff] %vm479_vm2, %v560_v31  ;;  %v619_v33 = vsub.f32 0.0, %v575_v32 }
 0x118   : > { %v590_v34 = vpop.f32.mrf.mxu2  ;;  %v605_v35 = vpop.f32.mrf.mxu3 }
 0x119   : > { %1041 = vst.msk [vmem:[%s1857_s27 + $0x18] sm:$0xff] %vm479_vm2, %v590_v34  ;;  %v625_v36 = vsub.f32 0.0, %v605_v35 }
 0x11c   : > { %v563_v37 = vpop.f32.mrf.mxu0  ;;  %v578_v38 = vpop.f32.mrf.mxu1 }
 0x11d   : > { %v617_v39 = vsub.f32 0.0, %v563_v37  ;;  %v620_v40 = vsub.f32 0.0, %v578_v38 }
 0x120   : > { %v593_v41 = vpop.f32.mrf.mxu2  ;;  %v608_v42 = vpop.f32.mrf.mxu3 }
 0x121   : > { %v623_v43 = vsub.f32 0.0, %v593_v41  ;;  %v626_v44 = vsub.f32 0.0, %v608_v42 }
 0x124   : > { %v566_v45 = vpop.f32.mrf.mxu0  ;;  %v581_v46 = vpop.f32.mrf.mxu1 }
 0x125   : > { %v618_v47 = vsub.f32 0.0, %v566_v45 }
 0x128   : > { %v596_v48 = vpop.f32.mrf.mxu2  ;;  %v611_v49 = vpop.f32.mrf.mxu3 }
 0x129   : > { %v624_v50 = vsub.f32 0.0, %v596_v48 }
 0x12c   : > { %v569_v51 = vpop.f32.mrf.mxu0  ;;  %v584_v52 = vpop.f32.mrf.mxu1  ;;  %634 = sbr.rel (%p1042_p5) target bundleno = 321 (0x141), region = 48 }
 0x130   : > { %v599_v53 = vpop.f32.mrf.mxu2  ;;  %v614_v54 = vpop.f32.mrf.mxu3 }
 0x131   : > { %635 = vst.msk [vmem:[%s1869_s0] sm:$0xff] %vm479_vm2, %v619_v33 }
 0x132   : > { %636 = vst.msk [vmem:[%s1869_s0 + $0x8] sm:$0xff] %vm479_vm2, %v620_v40 }
 0x133   : > { %1043 = vst.msk [vmem:[%s1869_s0 + $0x10] sm:$0xff] %vm479_vm2, %v581_v46 }
 0x134   : > { %1044 = vst.msk [vmem:[%s1869_s0 + $0x18] sm:$0xff] %vm479_vm2, %v584_v52 }
 0x135   : > { %640 = vst.msk [vmem:[%s1873_s16] sm:$0xff] %vm479_vm2, %v617_v39 }
 0x136   : > { %641 = vst.msk [vmem:[%s1873_s16 + $0x8] sm:$0xff] %vm479_vm2, %v618_v47 }
 0x137   : > { %1045 = vst.msk [vmem:[%s1873_s16 + $0x10] sm:$0xff] %vm479_vm2, %v569_v51 }
 0x138   : > { %1046 = vst.msk [vmem:[%s1873_s16 + $0x18] sm:$0xff] %vm479_vm2, %v572_v28 }
 0x139   : > { %1047 = vst.msk [vmem:[%s1869_s0 + $0x20] sm:$0xff] %vm479_vm2, %v625_v36 }
 0x13a   : > { %1048 = vst.msk [vmem:[%s1869_s0 + $0x28] sm:$0xff] %vm479_vm2, %v626_v44 }
 0x13b   : > { %1049 = vst.msk [vmem:[%s1869_s0 + $0x30] sm:$0xff] %vm479_vm2, %v611_v49 }
 0x13c   : > { %1050 = vst.msk [vmem:[%s1869_s0 + $0x38] sm:$0xff] %vm479_vm2, %v614_v54 }
 0x13d   : > { %1051 = vst.msk [vmem:[%s1873_s16 + $0x20] sm:$0xff] %vm479_vm2, %v623_v43 }
 0x13e   : > { %1052 = vst.msk [vmem:[%s1873_s16 + $0x28] sm:$0xff] %vm479_vm2, %v624_v50 }
 0x13f   : > { %1053 = vst.msk [vmem:[%s1873_s16 + $0x30] sm:$0xff] %vm479_vm2, %v599_v53 }
 0x140   : > { %1054 = vst.msk [vmem:[%s1873_s16 + $0x38] sm:$0xff] %vm479_vm2, %v602_v30 }
 0x141 PF: > { %p1055_p2 = scmp.ne.s32.totalorder %s1806_s24, 0 }
 0x143   : > { %660 = sbr.rel (%p1055_p2) target bundleno = 344 (0x158), region = 52 }
 0x148   : > { %661 = vst.msk [vmem:[%s1869_s0] sm:$0xff] %vm479_vm2, %v617_v39 }
 0x149   : > { %662 = vst.msk [vmem:[%s1869_s0 + $0x8] sm:$0xff] %vm479_vm2, %v618_v47 }
 0x14a   : > { %1056 = vst.msk [vmem:[%s1869_s0 + $0x10] sm:$0xff] %vm479_vm2, %v569_v51 }
 0x14b   : > { %1057 = vst.msk [vmem:[%s1869_s0 + $0x18] sm:$0xff] %vm479_vm2, %v572_v28 }
 0x14c   : > { %666 = vst.msk [vmem:[%s1873_s16] sm:$0xff] %vm479_vm2, %v619_v33 }
 0x14d   : > { %667 = vst.msk [vmem:[%s1873_s16 + $0x8] sm:$0xff] %vm479_vm2, %v620_v40 }
 0x14e   : > { %1058 = vst.msk [vmem:[%s1873_s16 + $0x10] sm:$0xff] %vm479_vm2, %v581_v46 }
 0x14f   : > { %1059 = vst.msk [vmem:[%s1873_s16 + $0x18] sm:$0xff] %vm479_vm2, %v584_v52 }
 0x150   : > { %1060 = vst.msk [vmem:[%s1869_s0 + $0x20] sm:$0xff] %vm479_vm2, %v623_v43 }
 0x151   : > { %1061 = vst.msk [vmem:[%s1869_s0 + $0x28] sm:$0xff] %vm479_vm2, %v624_v50 }
 0x152   : > { %1062 = vst.msk [vmem:[%s1869_s0 + $0x30] sm:$0xff] %vm479_vm2, %v599_v53 }
 0x153   : > { %1063 = vst.msk [vmem:[%s1869_s0 + $0x38] sm:$0xff] %vm479_vm2, %v602_v30 }
 0x154   : > { %1064 = vst.msk [vmem:[%s1873_s16 + $0x20] sm:$0xff] %vm479_vm2, %v625_v36 }
 0x155   : > { %1065 = vst.msk [vmem:[%s1873_s16 + $0x28] sm:$0xff] %vm479_vm2, %v626_v44 }
 0x156   : > { %1066 = vst.msk [vmem:[%s1873_s16 + $0x30] sm:$0xff] %vm479_vm2, %v611_v49 }
 0x157   : > { %1067 = vst.msk [vmem:[%s1873_s16 + $0x38] sm:$0xff] %vm479_vm2, %v614_v54 }
 0x158 PF: > { %s684_s7 = scalar_lea.sflag [#allocation7], %s1809_s21  ;;  %s1944_s10 = scalar_lea.sflag [#allocation13], %s381_s5 }
 0x159   : > { %s1082_s22 = sshll.u32 %s1605_s20, 4  ;;  %s716_s26 = sshll.u32 %s1857_s27, 4  ;;  %s717_s26 = int_to_ptr.vmem [resolvable:$true] %s716_s26 }
 0x15a   : > { %s2100_s9 = sld [smem:[#allocation51_spill]]  ;;  %s1476_s5 = smov 256  }
 0x15b   : > { %1124 = sst [smem:[#allocation22]] (%p1690_p10), %s1476_s5  ;;  %s1477_s25 = smov 2048  }
 0x15c   : > { %1125 = sst [smem:[#allocation22 + $0x1]] (%p1690_p10), %s1477_s25  ;;  %s1478_s8 = smov 2  }
 0x15d   : > { %1126 = sst [smem:[#allocation22 + $0x2]] (%p1690_p10), %s1478_s8  ;;  %s1479_s6 = smov 128  }
 0x15e   : > { %1127 = sst [smem:[#allocation22 + $0x3]] (%p1690_p10), %s1479_s6  ;;  %s1480_s24 = smov 8  }
 0x15f   : > { %1128 = sst [smem:[#allocation22 + $0x4]] (%p1690_p10), %s1479_s6  ;;  %s1481_s21 = smov [#allocation21]  }
 0x160   : > { %s705_s18 = scalar_lea.hbm %s2100_s9, %s1082_s22  ;;  %1129 = sst [smem:[#allocation22 + $0x5]] (%p1690_p10), %s1480_s24 }
 0x161   : > { %s718_s28 = sshll.u32 %s705_s18, 4  ;;  %s1482_s1 = smov 0   ;;  %s719_s28 = int_to_ptr.hbm [resolvable:$true] %s718_s28 }
 0x162   : > { %1130 = dma.general (%p1690_p10), %s717_s26, 512, %s719_s28, %s684_s7, %s1481_s21, [#allocation22], %s1482_s1, 0  }
 0x163   : > { %s1083_s30 = sshll.u32 %s1605_s20, 5  ;;  %s756_s27 = sshll.u32 %s1869_s0, 4  ;;  %s757_s27 = int_to_ptr.vmem [resolvable:$true] %s756_s27 }
 0x164   : > { %s2101_s23 = sld [smem:[#allocation52_spill]]  ;;  %s1483_s7 = smov 512  }
 0x165   : > { %1131 = sst [smem:[#allocation24]] (%p1690_p10), %s1483_s7  ;;  %s1484_s26 = smov 4096  }
 0x166   : > { %1132 = sst [smem:[#allocation24 + $0x1]] (%p1690_p10), %s1484_s26  ;;  %s1485_s28 = smov 4  }
 0x167   : > { %1133 = sst [smem:[#allocation24 + $0x2]] (%p1690_p10), %s1485_s28  ;;  %s1486_s20 = smov 128  }
 0x168   : > { %1134 = sst [smem:[#allocation24 + $0x3]] (%p1690_p10), %s1486_s20  ;;  %s1487_s0 = smov 8  }
 0x169   : > { %1135 = sst [smem:[#allocation24 + $0x4]] (%p1690_p10), %s1486_s20  ;;  %s1488_s5 = smov [#allocation23]  }
 0x16a   : > { %s745_s9 = scalar_lea.hbm %s2101_s23, %s1083_s30  ;;  %1136 = sst [smem:[#allocation24 + $0x5]] (%p1690_p10), %s1487_s0 }
 0x16b   : > { %s758_s18 = sshll.u32 %s745_s9, 4  ;;  %s1489_s25 = smov 0   ;;  %s759_s18 = int_to_ptr.hbm [resolvable:$true] %s758_s18 }
 0x16c   : > { %1137 = dma.general (%p1690_p10), %s757_s27, 1024, %s759_s18, %s1944_s10, %s1488_s5, [#allocation24], %s1489_s25, 0  }
 0x16d   : > { %s2102_s24 = sld [smem:[#allocation53_spill]]  ;;  %s796_s1 = sshll.u32 %s1873_s16, 4  ;;  %s797_s1 = int_to_ptr.vmem [resolvable:$true] %s796_s1 }
 0x16e   : > { %s1490_s29 = smov 512   ;;  %s1491_s27 = smov 4096  }
 0x16f   : > { %1138 = sst [smem:[#allocation26]] (%p1690_p10), %s1490_s29  ;;  %s1492_s23 = smov 4  }
 0x170   : > { %1139 = sst [smem:[#allocation26 + $0x1]] (%p1690_p10), %s1491_s27  ;;  %s1493_s9 = smov 128  }
 0x171   : > { %1140 = sst [smem:[#allocation26 + $0x2]] (%p1690_p10), %s1492_s23  ;;  %s1494_s16 = smov 8  }
 0x172   : > { %1141 = sst [smem:[#allocation26 + $0x3]] (%p1690_p10), %s1493_s9  ;;  %s1496_s18 = smov 0  }
 0x173   : > { %s785_s21 = scalar_lea.hbm %s2102_s24, %s1083_s30  ;;  %1142 = sst [smem:[#allocation26 + $0x4]] (%p1690_p10), %s1493_s9 }
 0x174   : > { %s798_s22 = sshll.u32 %s785_s21, 4  ;;  %1143 = sst [smem:[#allocation26 + $0x5]] (%p1690_p10), %s1494_s16  ;;  %s799_s22 = int_to_ptr.hbm [resolvable:$true] %s798_s22 }
 0x175   : > { %s1495_s30 = smov [#allocation25]  }
 0x176   : > { %1144 = dma.general (%p1690_p10), %s797_s1, 1024, %s799_s22, %s1944_s10, %s1495_s30, [#allocation26], %s1496_s18, 0  }
 0x177 PF: > { %s2103_s7 = sld [smem:[#allocation39_spill]]  ;;  %p1158_p7 = scmp.ge.s32.totalorder %s1453_s19, 2 }
 0x179   : > { %p1149_p8 = pnand %p1158_p7, %p1694_p3 }
 0x17b   : > { %p1150_p11 = pneg %p1149_p8 }
 0x17d   : > { %s826_s28 = sand.u32 1, %s2103_s7  }
 0x17e   : > { %s827_s20 = scalar_lea.sflag [#allocation7], %s826_s28 }
 0x17f   : > { %1396 = dma.done.wait (%p1150_p11), %s827_s20, 512  }
 0x180   : > { %1398 = vsyncadd (%p1150_p11), %s827_s20, 4294966784  ;;  %s2105_s0 = sadd.s32 4294967294, %s1453_s19  }
 0x181   : > { %s836_s5 = sand.u32 1, %s2105_s0  }
 0x182   : > { %s837_s25 = scalar_lea.sflag [#allocation13], %s836_s5 }
 0x183   : > { %1400 = dma.done.wait (%p1150_p11), %s837_s25, 2048  }
 0x184   : > { %1402 = vsyncadd (%p1150_p11), %s837_s25, 4294965248  ;;  %s2106_s19 = sld [smem:[#allocation43_spill]]  ;;  %s2115_s10 = smov %s1421_s11 }
 0x185   : > { %s2107_s0 = sld [smem:[#allocation40_spill]]  ;;  %s2116_s11 = smov %s1425_s12 }
 0x186   : > { %s2108_s1 = sld [smem:[#allocation41_spill]]  ;;  %s2121_s16 = smov %s1445_s17 }
 0x187   : > { %s2109_s9 = sld [smem:[#allocation47_spill]] }
 0x188   : > { %s2110_s13 = sld [smem:[#allocation48_spill]] }
 0x189   : > { %s2111_s8 = sld [smem:[#allocation45_spill]] }
 0x18a   : > { %s2112_s6 = sld [smem:[#allocation42_spill]]  ;;  %p40_p10 = scmp.ge.s32.totalorder %s2106_s19, 10  }
 0x18b   : > { %s2113_s18 = sld [smem:[#allocation44_spill]] }
 0x18c   :  { %42 = sbr.rel (!%p40_p10) target bundleno = 23 (0x17), region = 184 }
 0x18e   : > { %s2117_s12 = smov %s2110_s13  ;;  %s2118_s13 = smov %s1433_s14 }
 0x18f   : > { %s2119_s14 = smov %s1437_s15  ;;  %s2120_s15 = smov %s2111_s8 }
 0x190   : > { %s2122_s17 = smov %s2112_s6 }
 0x191   :  { %853 = vsyncpa [#allocation6], 1 }
 0x192   :  { %855 = vsyncpa [#allocation6 + $0x1], 1 }
 0x193   :  { %856 = vsyncpa [#allocation9], 1 }
 0x194   :  { %858 = vsyncpa [#allocation9 + $0x1], 1 }
 0x195   :  { %859 = vsyncpa [#allocation7], 1 }
 0x196   :  { %861 = vsyncpa [#allocation7 + $0x1], 1 }
 0x197   :  { %862 = vsyncpa [#allocation13], 1 }
 0x198   :  { %864 = vsyncpa [#allocation13 + $0x1], 1 }

</bundles_post_ra>
